<compile_context>
chip_gen: v7x
topology: tpu7x:2x2x1
jax: 0.10.0
libtpu: 0.0.40
codegen_flags: <defaults>
</compile_context>

<pallas_src>
import jax
import jax.numpy as jnp
from jax.experimental import pallas as pl
from jax.experimental.pallas import tpu as pltpu

FEAT_DIM = 32      # feat_dim = 32 in BEVBase.__init__
OUT_DIM = 2        # evidential reg-head output (concrete choice; base class abstract)
VOXEL_SIZE = 0.2   # cfg value
STRIDE = 2         # cfg value (only selects the conv_out pyramid level)


def _round_up(x, m):
    return ((x + m - 1) // m) * m


def _reg_head_kernel(feat_ref, w1_ref, b1_ref, w2_ref, b2_ref, reg_ref):
    """distr_reg: Linear(32,32) -> ReLU -> Linear(32,2) on the MXU, f32 accum."""
    f = feat_ref[...]                                                  # (tm, 32) f32
    h = jnp.dot(f, w1_ref[...], preferred_element_type=jnp.float32)    # MXU
    h = jnp.maximum(h + b1_ref[...], 0.0)                              # bias + ReLU (VPU)
    reg_ref[...] = (
        jnp.dot(h, w2_ref[...], preferred_element_type=jnp.float32)    # MXU
        + b2_ref[...]
    )


def bev_base_forward(coor, feat, w1, b1, w2, b2, *, voxel_size=VOXEL_SIZE, tm=4096):
    """Eval-mode BEVBase.forward core: returns (centers, reg).

    coor: (N, 3) int/float [batch_idx, x_idx, y_idx]; feat: (N, FEAT_DIM) float.
    Any sparse voxel count N is supported (partial boundary tiles are handled
    by Pallas' clipped block reads / discarded out-of-bounds writes).
    """
    N = feat.shape[0]

    # ---- indices2metric in the wrapper: trivially fusible elementwise op.
    coor_f = coor.astype(jnp.float32)
    scale = jnp.array([[1.0, voxel_size, voxel_size]], jnp.float32)
    offset = jnp.array([[0.0, 0.5 * voxel_size, 0.5 * voxel_size]], jnp.float32)
    centers = coor_f * scale + offset          # centers[:,0] is the (float) batch idx

    # ---- reg head on the MXU via Pallas, tiled over rows.
    tm_eff = min(tm, _round_up(max(N, 1), 8))  # block rows must be a multiple of 8
    grid = pl.cdiv(N, tm_eff)

    feat_f = feat.astype(jnp.float32)          # no-op for f32 inputs
    w1_f = w1.astype(jnp.float32)
    w2_f = w2.astype(jnp.float32)
    b1_f = b1.astype(jnp.float32).reshape(1, FEAT_DIM)
    b2_f = b2.astype(jnp.float32).reshape(1, OUT_DIM)

    reg = pl.pallas_call(
        _reg_head_kernel,
        out_shape=jax.ShapeDtypeStruct((N, OUT_DIM), jnp.float32),
        grid_spec=pltpu.PrefetchScalarGridSpec(
            num_scalar_prefetch=0,
            grid=(grid,),
            in_specs=[
                pl.BlockSpec((tm_eff, FEAT_DIM), lambda i: (i, 0)),     # feat tile
                pl.BlockSpec((FEAT_DIM, FEAT_DIM), lambda i: (0, 0)),   # W1 (resident)
                pl.BlockSpec((1, FEAT_DIM), lambda i: (0, 0)),          # b1
                pl.BlockSpec((FEAT_DIM, OUT_DIM), lambda i: (0, 0)),    # W2
                pl.BlockSpec((1, OUT_DIM), lambda i: (0, 0)),           # b2
            ],
            out_specs=pl.BlockSpec((tm_eff, OUT_DIM), lambda i: (i, 0)),
        ),
        compiler_params=pltpu.CompilerParams(
            dimension_semantics=("parallel",),        # rows are independent
            vmem_limit_bytes=32 * 1024 * 1024,
        ),
    )(feat_f, w1_f, b1_f, w2_f, b2_f)

    return centers, reg


def init_params(key):
    """Deterministic synthetic init of the reg-head parameters."""
    k1, k2 = jax.random.split(key)
    w1 = jax.random.normal(k1, (FEAT_DIM, FEAT_DIM), jnp.float32) * 0.1
    b1 = jnp.zeros((1, FEAT_DIM), jnp.float32)
    w2 = jax.random.normal(k2, (FEAT_DIM, OUT_DIM), jnp.float32) * 0.1
    b2 = jnp.zeros((1, OUT_DIM), jnp.float32)
    return w1, b1, w2, b2


if __name__ == "__main__":
    key = jax.random.PRNGKey(0)
    kc, kf, kp = jax.random.split(key, 3)

    N = 100  # number of active (sparse) BEV voxels — deliberately not a tile multiple
    batch_idx = jax.random.randint(kc, (N, 1), 0, 2)
    xy_idx = jax.random.randint(jax.random.fold_in(kc, 1), (N, 2), 0, 16)
    coor = jnp.concatenate([batch_idx, xy_idx], axis=1).astype(jnp.int32)
    feat = jax.random.normal(kf, (N, FEAT_DIM), jnp.float32)

    w1, b1, w2, b2 = init_params(kp)

    # ---- pure-JAX reference (f32 math, mirrors the module)
    coor_f = coor.astype(jnp.float32)
    centers_ref = jnp.concatenate(
        [coor_f[:, :1], (coor_f[:, 1:3] + 0.5) * VOXEL_SIZE], axis=1)
    h_ref = jnp.maximum(
        jnp.dot(feat, w1, preferred_element_type=jnp.float32) + b1, 0.0)
    reg_ref = jnp.dot(h_ref, w2, preferred_element_type=jnp.float32) + b2

    # Single-tile path (default tm): one partial block covering all 100 rows.
    centers, reg = bev_base_forward(coor, feat, w1, b1, w2, b2)
    jax.block_until_ready((centers, reg))
    assert jnp.allclose(centers, centers_ref, atol=1e-5)
    assert jnp.allclose(reg, reg_ref, atol=1e-2, rtol=1e-2)

    # Multi-tile path (tm=8 -> 13 grid steps, partial last tile).
    _, reg_small = bev_base_forward(coor, feat, w1, b1, w2, b2, tm=8)
    jax.block_until_ready(reg_small)
    assert jnp.allclose(reg_small, reg_ref, atol=1e-2, rtol=1e-2)

    # TODO(synk): training-mode random down_sample and the abstract
    # draw_distribution / loss / get_reg_layer / box- & road-based sampling of
    # subclasses (points_in_boxes_gpu etc.) are not realizable from the base
    # class alone; only the concrete eval-path forward compute is kernelized.
    print("KERNEL_OK")
</pallas_src>

<mosaic_0001>
module attributes {stable_mosaic.version = 11 : i64} {
  func.func @_reg_head_kernel(%arg0: i32, %arg1: memref<104x32xf32, #tpu.memory_space<vmem>>, %arg2: memref<32x32xf32, #tpu.memory_space<vmem>>, %arg3: memref<1x32xf32, #tpu.memory_space<vmem>>, %arg4: memref<32x2xf32, #tpu.memory_space<vmem>>, %arg5: memref<1x2xf32, #tpu.memory_space<vmem>>, %arg6: memref<104x2xf32, #tpu.memory_space<vmem>>) attributes {dimension_semantics = [#tpu.dimension_semantics<parallel>], iteration_bounds = array<i64: 1>, scalar_prefetch = 0 : i64, scratch_operands = 0 : i64, tpu.core_type = #tpu.core_type<tc>, window_params = [{transform_indices = @transform_0, window_bounds = array<i64: 104, 32>}, {pipeline_mode = #tpu.pipeline_mode<synchronous>, transform_indices = @transform_1, window_bounds = array<i64: 32, 32>}, {pipeline_mode = #tpu.pipeline_mode<synchronous>, transform_indices = @transform_2, window_bounds = array<i64: 1, 32>}, {pipeline_mode = #tpu.pipeline_mode<synchronous>, transform_indices = @transform_3, window_bounds = array<i64: 32, 2>}, {pipeline_mode = #tpu.pipeline_mode<synchronous>, transform_indices = @transform_4, window_bounds = array<i64: 1, 2>}, {transform_indices = @transform_5, window_bounds = array<i64: 104, 2>}]} {
    %c0 = arith.constant 0 : index
    %c0_0 = arith.constant 0 : index
    %0 = vector.load %arg1[%c0, %c0_0] : memref<104x32xf32, #tpu.memory_space<vmem>>, vector<104x32xf32>
    %c0_1 = arith.constant 0 : index
    %c0_2 = arith.constant 0 : index
    %1 = vector.load %arg2[%c0_1, %c0_2] : memref<32x32xf32, #tpu.memory_space<vmem>>, vector<32x32xf32>
    %cst = arith.constant dense<0.000000e+00> : vector<104x32xf32>
    %2 = tpu.matmul %0, %1, %cst {dimension_numbers = #tpu.dot_dimension_numbers<[1], [0], [0], [1], [0, 0, 1, 1], [], []>} : vector<104x32xf32>, vector<32x32xf32>, vector<104x32xf32> -> vector<104x32xf32>
    %c0_3 = arith.constant 0 : index
    %c0_4 = arith.constant 0 : index
    %3 = vector.load %arg3[%c0_3, %c0_4] : memref<1x32xf32, #tpu.memory_space<vmem>>, vector<1x32xf32>
    %4 = vector.broadcast %3 : vector<1x32xf32> to vector<104x32xf32>
    %5 = arith.addf %2, %4 : vector<104x32xf32>
    %cst_5 = arith.constant 0.000000e+00 : f32
    %6 = vector.broadcast %cst_5 : f32 to vector<104x32xf32>
    %7 = arith.maximumf %5, %6 : vector<104x32xf32>
    %c0_6 = arith.constant 0 : index
    %c0_7 = arith.constant 0 : index
    %8 = vector.load %arg4[%c0_6, %c0_7] : memref<32x2xf32, #tpu.memory_space<vmem>>, vector<32x2xf32>
    %cst_8 = arith.constant dense<0.000000e+00> : vector<104x2xf32>
    %9 = tpu.matmul %7, %8, %cst_8 {dimension_numbers = #tpu.dot_dimension_numbers<[1], [0], [0], [1], [0, 0, 1, 1], [], []>} : vector<104x32xf32>, vector<32x2xf32>, vector<104x2xf32> -> vector<104x2xf32>
    %c0_9 = arith.constant 0 : index
    %c0_10 = arith.constant 0 : index
    %10 = vector.load %arg5[%c0_9, %c0_10] : memref<1x2xf32, #tpu.memory_space<vmem>>, vector<1x2xf32>
    %11 = vector.broadcast %10 : vector<1x2xf32> to vector<104x2xf32>
    %12 = arith.addf %9, %11 : vector<104x2xf32>
    %c0_11 = arith.constant 0 : index
    %c0_12 = arith.constant 0 : index
    %13 = vector.load %arg6[%c0_11, %c0_12] : memref<104x2xf32, #tpu.memory_space<vmem>>, vector<104x2xf32>
    tpu.vector_store %arg6[%c0_11, %c0_12], %12 {strides = array<i32>} : memref<104x2xf32, #tpu.memory_space<vmem>>, vector<104x2xf32>,
    return
  }
  func.func @transform_0(%arg0: i32) -> (i32, i32) {
    %c0_i32 = arith.constant 0 : i32
    %c0_i32_0 = arith.constant 0 : i32
    return %arg0, %c0_i32 : i32, i32
  }
  func.func @transform_1(%arg0: i32) -> (i32, i32) {
    %c0_i32 = arith.constant 0 : i32
    %c0_i32_0 = arith.constant 0 : i32
    %c0_i32_1 = arith.constant 0 : i32
    return %c0_i32, %c0_i32_0 : i32, i32
  }
  func.func @transform_2(%arg0: i32) -> (i32, i32) {
    %c0_i32 = arith.constant 0 : i32
    %c0_i32_0 = arith.constant 0 : i32
    %c0_i32_1 = arith.constant 0 : i32
    return %c0_i32, %c0_i32_0 : i32, i32
  }
  func.func @transform_3(%arg0: i32) -> (i32, i32) {
    %c0_i32 = arith.constant 0 : i32
    %c0_i32_0 = arith.constant 0 : i32
    %c0_i32_1 = arith.constant 0 : i32
    return %c0_i32, %c0_i32_0 : i32, i32
  }
  func.func @transform_4(%arg0: i32) -> (i32, i32) {
    %c0_i32 = arith.constant 0 : i32
    %c0_i32_0 = arith.constant 0 : i32
    %c0_i32_1 = arith.constant 0 : i32
    return %c0_i32, %c0_i32_0 : i32, i32
  }
  func.func @transform_5(%arg0: i32) -> (i32, i32) {
    %c0_i32 = arith.constant 0 : i32
    %c0_i32_0 = arith.constant 0 : i32
    return %arg0, %c0_i32 : i32, i32
  }
}

</mosaic_0001>

<bundles_post_ra>
// kernel: tpu_custom_call.1
= control target key start
LH: loop header
LB: loop body
LE: loop exit
PB: predicated region body
PF: predicated region fallthrough
CT: control target
= control target key end

     0   :  { %v596_v0 = vmov 0.0|0.0   ;;  %vm597_vm0 = vmmov 0   ;;  %v598_v4 = vmov 0.0   ;;  %vm44_vm1 = vcmask 261120   ;;  %s843_s1 = inlined_call_operand.vmem [shape: f32[32,32], index: 1, kind: input, shape index: {}]   ;;  %s844_s3 = inlined_call_operand.vmem [shape: f32[32,2], index: 3, kind: input, shape index: {}]   ;;  %s845_s0 = inlined_call_operand.vmem [shape: f32[100,32], index: 0, kind: input, shape index: {}]   ;;  %s846_s2 = inlined_call_operand.vmem [shape: f32[1,32], index: 2, kind: input, shape index: {}]   ;;  %s847_s4 = inlined_call_operand.vmem [shape: f32[1,2], index: 4, kind: input, shape index: {}]   ;;  %s848_s5 = inlined_call_operand.vmem [shape: f32[100,2], index: 5, kind: output, shape index: {}]  }
   0x1   :  { %581 = vmatprep.subr.bf16.mxu0 %v596_v0  ;;  %v33_v1 = vld [vmem:[%s843_s1] sm:$0xff]  ;;  %v34_v2 = vld [vmem:[%s843_s1 + $0x8] sm:$0xff]  ;;  %v35_v3 = vld [vmem:[%s843_s1 + $0x10] sm:$0xff]  ;;  %495 = vmatprep.mubr.msk.f32.mxu0 %vm597_vm0, %v598_v4  ;;  %vm407_vm2 = vcmask 15360  }
   0x2   :  { %v582_v5 = vpack.c.bf16 %v34_v2, %v33_v1  ;;  %v36_v6 = vld [vmem:[%s843_s1 + $0x18] sm:$0xff]  ;;  %587 = vmatprep.subr.bf16.mxu1 %v596_v0  ;;  %542 = vmatprep.mubr.msk.f32.mxu1 %vm597_vm0, %v598_v4  ;;  %v227_v8 = vld [vmem:[%s844_s3] sm:$0xff]  ;;  %v228_v9 = vld [vmem:[%s844_s3 + $0x8] sm:$0xff] }
   0x3   :  { %v585_v7 = vpack.c.bf16 %v36_v6, %v35_v3  ;;  %v20_v10 = vld [vmem:[%s845_s0] sm:$0xff]  ;;  %v588_v11 = vpack.c.bf16 %v228_v9, %v227_v8  ;;  %v21_v12 = vld [vmem:[%s845_s0 + $0x8] sm:$0xff]  ;;  %v22_v13 = vld [vmem:[%s845_s0 + $0x10] sm:$0xff] }
   0x4   :  { %583 = vmatpush3.bf16.msra.mxu0 %v582_v5  ;;  %v23_v14 = vld [vmem:[%s845_s0 + $0x18] sm:$0xff]  ;;  %v24_v15 = vld [vmem:[%s845_s0 + $0x20] sm:$0xff]  ;;  %v25_v16 = vld [vmem:[%s845_s0 + $0x28] sm:$0xff] }
   0x5   :  { %584 = vmatprep.subr.bf16.mxu0 %v596_v0  ;;  %589 = vmatpush3.bf16.msra.mxu1 %v588_v11  ;;  %v26_v17 = vld [vmem:[%s845_s0 + $0x30] sm:$0xff]  ;;  %v27_v18 = vld [vmem:[%s845_s0 + $0x38] sm:$0xff]  ;;  %v28_v19 = vld [vmem:[%s845_s0 + $0x40] sm:$0xff] }
   0x6   :  { %590 = vmatprep.subr.bf16.mxu1 %v596_v0  ;;  %v29_v20 = vld [vmem:[%s845_s0 + $0x48] sm:$0xff]  ;;  %v30_v21 = vld [vmem:[%s845_s0 + $0x50] sm:$0xff]  ;;  %v31_v22 = vld [vmem:[%s845_s0 + $0x58] sm:$0xff] }
   0x7   :  { %v32_v23 = vld [vmem:[%s845_s0 + $0x60] sm:$0xff]  ;;  %v229_v24 = vld [vmem:[%s844_s3 + $0x10] sm:$0xff]  ;;  %v230_v25 = vld [vmem:[%s844_s3 + $0x18] sm:$0xff] }
   0x8   :  { %586 = vmatpush3.bf16.msra.mxu0 %v585_v7  ;;  %v591_v26 = vpack.c.bf16 %v230_v25, %v229_v24  ;;  %v736_v27 = vld [vmem:[%s846_s2] ss:$0 sm:$0xff] }
   0xa   :  { %592 = vmatpush3.bf16.msra.mxu1 %v591_v26 }
   0xb   :  { %496 = vmatmul.mubr.msk.f32.vlgmr.msra.gmra.mrb[0].mxu0 %vm44_vm1, %v20_v10 }
   0xc   :  { %498 = vmatprep.mubr.msk.f32.mxu0 %vm597_vm0, %v598_v4 }
   0xf   :  { %499 = vmatmul.mubr.msk.f32.gmra.mrb[2].mxu0 %vm44_vm1, %v21_v12 }
  0x10   :  { %501 = vmatprep.mubr.msk.f32.mxu0 %vm597_vm0, %v598_v4 }
  0x13   :  { %502 = vmatmul.mubr.msk.f32.gmra.mrb[4].mxu0 %vm44_vm1, %v22_v13 }
  0x14   :  { %504 = vmatprep.mubr.msk.f32.mxu0 %vm597_vm0, %v598_v4 }
  0x17   :  { %505 = vmatmul.mubr.msk.f32.gmra.mrb[6].mxu0 %vm44_vm1, %v23_v14 }
  0x18   :  { %507 = vmatprep.mubr.msk.f32.mxu0 %vm597_vm0, %v598_v4 }
  0x1b   :  { %508 = vmatmul.mubr.msk.f32.gmra.mrb[8].mxu0 %vm44_vm1, %v24_v15 }
  0x1c   :  { %510 = vmatprep.mubr.msk.f32.mxu0 %vm597_vm0, %v598_v4 }
  0x1f   :  { %511 = vmatmul.mubr.msk.f32.gmra.mrb[10].mxu0 %vm44_vm1, %v25_v16 }
  0x20   :  { %513 = vmatprep.mubr.msk.f32.mxu0 %vm597_vm0, %v598_v4 }
  0x23   :  { %514 = vmatmul.mubr.msk.f32.gmra.mrb[12].mxu0 %vm44_vm1, %v26_v17  ;;  %v439_v17 = vld [vmem:[%s847_s4] ss:$0 sm:$0xff] }
  0x24   :  { %516 = vmatprep.mubr.msk.f32.mxu0 %vm597_vm0, %v598_v4 }
  0x27   :  { %517 = vmatmul.mubr.msk.f32.gmra.mrb[14].mxu0 %vm44_vm1, %v27_v18 }
  0x28   :  { %519 = vmatprep.mubr.msk.f32.mxu0 %vm597_vm0, %v598_v4 }
  0x2b   :  { %520 = vmatmul.mubr.msk.f32.gmra.mrb[16].mxu0 %vm44_vm1, %v28_v19 }
  0x2c   :  { %522 = vmatprep.mubr.msk.f32.mxu0 %vm597_vm0, %v598_v4 }
  0x2f   :  { %523 = vmatmul.mubr.msk.f32.gmra.mrb[18].mxu0 %vm44_vm1, %v29_v20 }
  0x30   :  { %525 = vmatprep.mubr.msk.f32.mxu0 %vm597_vm0, %v598_v4 }
  0x33   :  { %526 = vmatmul.mubr.msk.f32.gmra.mrb[20].mxu0 %vm44_vm1, %v30_v21 }
  0x34   :  { %528 = vmatprep.mubr.msk.f32.mxu0 %vm597_vm0, %v598_v4 }
  0x37   :  { %529 = vmatmul.mubr.msk.f32.gmra.mrb[22].mxu0 %vm44_vm1, %v31_v22 }
  0x38   :  { %531 = vmatprep.mubr.msk.f32.mxu0 %vm597_vm0, %v598_v4 }
  0x3b   :  { %532 = vmatmul.mubr.msk.f32.gmra.mrb[24].mxu0 %vm44_vm1, %v32_v23 }
  0xde   :  { %v150_v28 = vpop.f32.mrb[0].mxu0 }
  0xdf   :  { %v151_v29 = vadd.f32 %v736_v27, %v150_v28  ;;  %v497_v30 = vpop.f32.mrb[1].mxu0 }
  0xe1   :  { %v214_v31 = vmax.f32 %v151_v29, 0.0 }
  0xe2   :  { %v155_v32 = vpop.f32.mrb[2].mxu0 }
  0xe3   :  { %v156_v33 = vadd.f32 %v736_v27, %v155_v32  ;;  %v500_v34 = vpop.f32.mrb[3].mxu0  ;;  %543 = vmatmul.mubr.msk.f32.vlgmr.msra.gmra.mrb[0].mxu1 %vm44_vm1, %v214_v31 }
  0xe4   :  { %545 = vmatprep.mubr.msk.f32.mxu1 %vm597_vm0, %v598_v4 }
  0xe5   :  { %v215_v35 = vmax.f32 %v156_v33, 0.0 }
  0xe6   :  { %v160_v36 = vpop.f32.mrb[4].mxu0 }
  0xe7   :  { %v161_v37 = vadd.f32 %v736_v27, %v160_v36  ;;  %v503_v38 = vpop.f32.mrb[5].mxu0  ;;  %546 = vmatmul.mubr.msk.f32.gmra.mrb[2].mxu1 %vm44_vm1, %v215_v35 }
  0xe8   :  { %548 = vmatprep.mubr.msk.f32.mxu1 %vm597_vm0, %v598_v4 }
  0xe9   :  { %v216_v39 = vmax.f32 %v161_v37, 0.0 }
  0xea   :  { %v165_v40 = vpop.f32.mrb[6].mxu0 }
  0xeb   :  { %v166_v41 = vadd.f32 %v736_v27, %v165_v40  ;;  %v506_v42 = vpop.f32.mrb[7].mxu0  ;;  %549 = vmatmul.mubr.msk.f32.gmra.mrb[4].mxu1 %vm44_vm1, %v216_v39 }
  0xec   :  { %551 = vmatprep.mubr.msk.f32.mxu1 %vm597_vm0, %v598_v4 }
  0xed   :  { %v217_v43 = vmax.f32 %v166_v41, 0.0 }
  0xee   :  { %v170_v44 = vpop.f32.mrb[8].mxu0 }
  0xef   :  { %v171_v45 = vadd.f32 %v736_v27, %v170_v44  ;;  %v509_v46 = vpop.f32.mrb[9].mxu0  ;;  %552 = vmatmul.mubr.msk.f32.gmra.mrb[6].mxu1 %vm44_vm1, %v217_v43 }
  0xf0   :  { %554 = vmatprep.mubr.msk.f32.mxu1 %vm597_vm0, %v598_v4 }
  0xf1   :  { %v218_v47 = vmax.f32 %v171_v45, 0.0 }
  0xf2   :  { %v175_v48 = vpop.f32.mrb[10].mxu0 }
  0xf3   :  { %v176_v49 = vadd.f32 %v736_v27, %v175_v48  ;;  %v512_v50 = vpop.f32.mrb[11].mxu0  ;;  %555 = vmatmul.mubr.msk.f32.gmra.mrb[8].mxu1 %vm44_vm1, %v218_v47 }
  0xf4   :  { %557 = vmatprep.mubr.msk.f32.mxu1 %vm597_vm0, %v598_v4 }
  0xf5   :  { %v219_v51 = vmax.f32 %v176_v49, 0.0 }
  0xf6   :  { %v180_v52 = vpop.f32.mrb[12].mxu0 }
  0xf7   :  { %v181_v53 = vadd.f32 %v736_v27, %v180_v52  ;;  %v515_v54 = vpop.f32.mrb[13].mxu0  ;;  %558 = vmatmul.mubr.msk.f32.gmra.mrb[10].mxu1 %vm44_vm1, %v219_v51 }
  0xf8   :  { %560 = vmatprep.mubr.msk.f32.mxu1 %vm597_vm0, %v598_v4 }
  0xf9   :  { %v220_v55 = vmax.f32 %v181_v53, 0.0 }
  0xfa   :  { %v185_v56 = vpop.f32.mrb[14].mxu0 }
  0xfb   :  { %v186_v57 = vadd.f32 %v736_v27, %v185_v56  ;;  %v518_v58 = vpop.f32.mrb[15].mxu0  ;;  %561 = vmatmul.mubr.msk.f32.gmra.mrb[12].mxu1 %vm44_vm1, %v220_v55 }
  0xfc   :  { %563 = vmatprep.mubr.msk.f32.mxu1 %vm597_vm0, %v598_v4 }
  0xfd   :  { %v221_v59 = vmax.f32 %v186_v57, 0.0 }
  0xfe   :  { %v190_v60 = vpop.f32.mrb[16].mxu0 }
  0xff   :  { %v191_v61 = vadd.f32 %v736_v27, %v190_v60  ;;  %v521_v62 = vpop.f32.mrb[17].mxu0  ;;  %564 = vmatmul.mubr.msk.f32.gmra.mrb[14].mxu1 %vm44_vm1, %v221_v59 }
 0x100   :  { %566 = vmatprep.mubr.msk.f32.mxu1 %vm597_vm0, %v598_v4 }
 0x101   :  { %v222_v63 = vmax.f32 %v191_v61, 0.0 }
 0x102   :  { %v195_v0 = vpop.f32.mrb[18].mxu0 }
 0x103   :  { %v196_v1 = vadd.f32 %v736_v27, %v195_v0  ;;  %v524_v2 = vpop.f32.mrb[19].mxu0  ;;  %567 = vmatmul.mubr.msk.f32.gmra.mrb[16].mxu1 %vm44_vm1, %v222_v63 }
 0x104   :  { %569 = vmatprep.mubr.msk.f32.mxu1 %vm597_vm0, %v598_v4 }
 0x105   :  { %v223_v3 = vmax.f32 %v196_v1, 0.0 }
 0x106   :  { %v200_v5 = vpop.f32.mrb[20].mxu0 }
 0x107   :  { %v201_v6 = vadd.f32 %v736_v27, %v200_v5  ;;  %v527_v7 = vpop.f32.mrb[21].mxu0  ;;  %570 = vmatmul.mubr.msk.f32.gmra.mrb[18].mxu1 %vm44_vm1, %v223_v3 }
 0x108   :  { %572 = vmatprep.mubr.msk.f32.mxu1 %vm597_vm0, %v598_v4 }
 0x109   :  { %v224_v8 = vmax.f32 %v201_v6, 0.0 }
 0x10a   :  { %v205_v9 = vpop.f32.mrb[22].mxu0 }
 0x10b   :  { %v206_v10 = vadd.f32 %v736_v27, %v205_v9  ;;  %v530_v11 = vpop.f32.mrb[23].mxu0  ;;  %573 = vmatmul.mubr.msk.f32.gmra.mrb[20].mxu1 %vm44_vm1, %v224_v8 }
 0x10c   :  { %575 = vmatprep.mubr.msk.f32.mxu1 %vm597_vm0, %v598_v4 }
 0x10d   :  { %v225_v12 = vmax.f32 %v206_v10, 0.0 }
 0x10e   :  { %v210_v13 = vpop.f32.mrb[24].mxu0 }
 0x10f   :  { %v211_v14 = vadd.f32 %v736_v27, %v210_v13  ;;  %v533_v15 = vpop.f32.mrb[25].mxu0  ;;  %576 = vmatmul.mubr.msk.f32.gmra.mrb[22].mxu1 %vm44_vm1, %v225_v12 }
 0x110   :  { %578 = vmatprep.mubr.msk.f32.mxu1 %vm597_vm0, %v598_v4 }
 0x111   :  { %v226_v16 = vmax.f32 %v211_v14, 0.0 }
 0x113   :  { %579 = vmatmul.mubr.msk.f32.gmra.mrb[24].mxu1 %vm44_vm1, %v226_v16 }
 0x1b6   :  { %v343_v18 = vpop.f32.mrb[0].mxu1 }
 0x1b7   :  { %v344_v19 = vadd.f32 %v439_v17, %v343_v18  ;;  %v544_v20 = vpop.f32.mrb[1].mxu1 }
 0x1b9   :  { %408 = vst.msk [vmem:[%s848_s5] sm:$0xff] %vm407_vm2, %v344_v19 }
 0x1ba   :  { %v348_v21 = vpop.f32.mrb[2].mxu1 }
 0x1bb   :  { %v349_v22 = vadd.f32 %v439_v17, %v348_v21  ;;  %v547_v23 = vpop.f32.mrb[3].mxu1 }
 0x1bd   :  { %409 = vst.msk [vmem:[%s848_s5 + $0x8] sm:$0xff] %vm407_vm2, %v349_v22 }
 0x1be   :  { %v353_v4 = vpop.f32.mrb[4].mxu1 }
 0x1bf   :  { %v354_v24 = vadd.f32 %v439_v17, %v353_v4  ;;  %v550_v25 = vpop.f32.mrb[5].mxu1 }
 0x1c1   :  { %410 = vst.msk [vmem:[%s848_s5 + $0x10] sm:$0xff] %vm407_vm2, %v354_v24 }
 0x1c2   :  { %v358_v26 = vpop.f32.mrb[6].mxu1 }
 0x1c3   :  { %v359_v27 = vadd.f32 %v439_v17, %v358_v26  ;;  %v553_v28 = vpop.f32.mrb[7].mxu1 }
 0x1c5   :  { %411 = vst.msk [vmem:[%s848_s5 + $0x18] sm:$0xff] %vm407_vm2, %v359_v27 }
 0x1c6   :  { %v363_v29 = vpop.f32.mrb[8].mxu1 }
 0x1c7   :  { %v364_v30 = vadd.f32 %v439_v17, %v363_v29  ;;  %v556_v31 = vpop.f32.mrb[9].mxu1 }
 0x1c9   :  { %412 = vst.msk [vmem:[%s848_s5 + $0x20] sm:$0xff] %vm407_vm2, %v364_v30 }
 0x1ca   :  { %v368_v32 = vpop.f32.mrb[10].mxu1 }
 0x1cb   :  { %v369_v33 = vadd.f32 %v439_v17, %v368_v32  ;;  %v559_v34 = vpop.f32.mrb[11].mxu1 }
 0x1cd   :  { %413 = vst.msk [vmem:[%s848_s5 + $0x28] sm:$0xff] %vm407_vm2, %v369_v33 }
 0x1ce   :  { %v373_v35 = vpop.f32.mrb[12].mxu1 }
 0x1cf   :  { %v374_v36 = vadd.f32 %v439_v17, %v373_v35  ;;  %v562_v37 = vpop.f32.mrb[13].mxu1 }
 0x1d1   :  { %414 = vst.msk [vmem:[%s848_s5 + $0x30] sm:$0xff] %vm407_vm2, %v374_v36 }
 0x1d2   :  { %v378_v38 = vpop.f32.mrb[14].mxu1 }
 0x1d3   :  { %v379_v39 = vadd.f32 %v439_v17, %v378_v38  ;;  %v565_v40 = vpop.f32.mrb[15].mxu1 }
 0x1d5   :  { %415 = vst.msk [vmem:[%s848_s5 + $0x38] sm:$0xff] %vm407_vm2, %v379_v39 }
 0x1d6   :  { %v383_v41 = vpop.f32.mrb[16].mxu1 }
 0x1d7   :  { %v384_v42 = vadd.f32 %v439_v17, %v383_v41  ;;  %v568_v43 = vpop.f32.mrb[17].mxu1 }
 0x1d9   :  { %416 = vst.msk [vmem:[%s848_s5 + $0x40] sm:$0xff] %vm407_vm2, %v384_v42 }
 0x1da   :  { %v388_v44 = vpop.f32.mrb[18].mxu1 }
 0x1db   :  { %v389_v45 = vadd.f32 %v439_v17, %v388_v44  ;;  %v571_v46 = vpop.f32.mrb[19].mxu1 }
 0x1dd   :  { %417 = vst.msk [vmem:[%s848_s5 + $0x48] sm:$0xff] %vm407_vm2, %v389_v45 }
 0x1de   :  { %v393_v47 = vpop.f32.mrb[20].mxu1 }
 0x1df   :  { %v394_v48 = vadd.f32 %v439_v17, %v393_v47  ;;  %v574_v49 = vpop.f32.mrb[21].mxu1 }
 0x1e1   :  { %418 = vst.msk [vmem:[%s848_s5 + $0x50] sm:$0xff] %vm407_vm2, %v394_v48 }
 0x1e2   :  { %v398_v50 = vpop.f32.mrb[22].mxu1 }
 0x1e3   :  { %v399_v51 = vadd.f32 %v439_v17, %v398_v50  ;;  %v577_v52 = vpop.f32.mrb[23].mxu1 }
 0x1e5   :  { %419 = vst.msk [vmem:[%s848_s5 + $0x58] sm:$0xff] %vm407_vm2, %v399_v51 }
 0x1e6   :  { %v403_v53 = vpop.f32.mrb[24].mxu1 }
 0x1e7   :  { %v404_v54 = vadd.f32 %v439_v17, %v403_v53  ;;  %v580_v55 = vpop.f32.mrb[25].mxu1 }
 0x1e9   :  { %420 = vst.msk [vmem:[%s848_s5 + $0x60] sm:$0xff] %vm407_vm2, %v404_v54 }

</bundles_post_ra>
